<compile_context>
chip_gen: v5e
topology: v5e:2x2
jax: 0.10.0
libtpu: 0.0.40
codegen_flags: <defaults>
</compile_context>

<pallas_src>
import math
import random

import jax
import jax.numpy as jnp
import numpy as np
from jax.experimental import pallas as pl
from jax.experimental.pallas import tpu as pltpu


def _round_up(a: int, b: int) -> int:
    return (a + b - 1) // b * b


def _cdiv(a: int, b: int) -> int:
    return (a + b - 1) // b


def _make_kernel(T: int, KW: int):
    """norm = |re + i*im|; acc += norm @ W_tile; out = acc**2 at the last K step."""

    def kernel(kb_ref, re_ref, im_ref, w_ref, o_ref, acc_ref):
        k = pl.program_id(2)

        @pl.when(k == 0)
        def _():
            acc_ref[...] = jnp.zeros_like(acc_ref)

        re = re_ref[...]                       # (tm, KW)
        im = im_ref[...]
        norm = jnp.sqrt(re * re + im * im)     # VPU

        # Mask columns past the real time extent T: boundary K blocks can hold
        # uninitialized data, and garbage * 0 could be NaN on the MXU path.
        col0 = (kb_ref[pl.program_id(1)] + k) * KW
        col = col0 + jax.lax.broadcasted_iota(jnp.int32, norm.shape, 1)
        norm = jnp.where(col < T, norm, 0.0)

        acc_ref[...] += jnp.dot(
            norm, w_ref[0],
            preferred_element_type=jnp.float32,
            precision=jax.lax.Precision.HIGHEST)   # pinned: 1e-5 tolerance

        @pl.when(k == pl.num_programs(2) - 1)
        def _():
            mag = acc_ref[...]
            o_ref[...] = mag * mag             # .abs().pow(2)

    return kernel


def dynamic_time_stretch_power(x, rate, *, hop_length, n_freq):
    """Pallas equivalent of DynamicTimeStretch.forward for a fixed stretch rate.

    x    : complex64 array, shape (B, F, T) with F == n_freq == n_fft//2 + 1
    rate : python float (drawn host-side, like random.random() in torch)
    returns float32 power spectrogram of shape (B, F, T_out),
            T_out = len(arange(0, T, rate))  (matches torchaudio.phase_vocoder)

    hop_length only affects phase_advance, which is mathematically irrelevant
    after abs()**2 — accepted but unused.
    """
    del hop_length  # see docstring
    B, F, T = x.shape
    assert F == n_freq
    rate = float(rate)

    # ---- host-static setup, mirrors torchaudio.functional.phase_vocoder ----
    time_steps = np.arange(0, T, rate, dtype=np.float64)   # == torch.arange(0, T, rate)
    T_out = int(time_steps.shape[0])
    idx0 = np.minimum(np.floor(time_steps).astype(np.int64), T - 1)
    alphas = (time_steps - np.floor(time_steps)).astype(np.float32)

    # ---- row tiling ----
    M = B * F
    if M <= 256:
        tm = M                                   # block == full dim -> always legal
    else:
        tm = min((128, 256), key=lambda c: ((-M) % c, -c))   # least pad waste, tie->256
    gm = _cdiv(M, tm)

    # ---- dense vs banded W ----
    tn_banded = 256
    KW_banded = _round_up(int(math.ceil(tn_banded * rate)) + 2, 128)
    dense_w_bytes = T * T_out * 4
    use_dense = (dense_w_bytes <= (4 << 20)) or (T <= 2 * KW_banded)

    if use_dense:
        # Dense resident W (small T): gn = gk = 1, no padding anywhere.
        tn, KW, gn, gk = T_out, T, 1, 1
        kb_np = np.zeros((1,), np.int32)
        W_np = np.zeros((1, T, T_out), np.float32)
        cols = np.arange(T_out)
        W_np[0, idx0, cols] += 1.0 - alphas
        valid = idx0 + 1 < T                     # idx0+1 == T hits the zero pad frame
        W_np[0, idx0[valid] + 1, cols[valid]] += alphas[valid]
    else:
        # Banded W: each output tile j only needs input columns in a window of
        # ~tn*rate+2; cover it with 2 aligned KW blocks starting at kb[j]*KW.
        tn, KW, gk = tn_banded, KW_banded, 2
        gn = _cdiv(T_out, tn)
        max_kb = max(_cdiv(T, KW) - gk, 0)       # never index a fully-OOB K block
        kb_np = np.zeros((gn,), np.int32)
        W_np = np.zeros((gn, gk * KW, tn), np.float32)
        for j in range(gn):
            c0, c1 = j * tn, min((j + 1) * tn, T_out)
            kb_j = min(int(idx0[c0]) // KW, max_kb)
            kb_np[j] = kb_j
            base = kb_j * KW
            cols = np.arange(c0, c1)
            r0 = idx0[cols] - base
            assert r0.min() >= 0 and r0.max() < gk * KW, "banded window too narrow"
            W_np[j, r0, cols - c0] += 1.0 - alphas[cols]
            valid = idx0[cols] + 1 < T
            r1 = idx0[cols] + 1 - base
            assert (not valid.any()) or int(r1[valid].max()) < gk * KW
            W_np[j, r1[valid], (cols - c0)[valid]] += alphas[cols][valid]

    W = jnp.asarray(W_np)
    kb = jnp.asarray(kb_np)

    # No host-side stack/pad: two un-padded f32 views of the spectrogram.
    x_re = jnp.real(x).astype(jnp.float32).reshape(M, T)
    x_im = jnp.imag(x).astype(jnp.float32).reshape(M, T)

    # ---- VMEM budget: double-buffered tiles + accumulator + norm/mag temporaries ----
    in_bytes = 2 * (2 * tm * KW * 4)             # re + im, double-buffered
    w_bytes = 2 * (KW * tn * 4)                  # W tile, double-buffered
    out_bytes = 2 * (tm * tn * 4)
    acc_bytes = tm * tn * 4
    tmp_bytes = 3 * tm * KW * 4 + 2 * tm * tn * 4  # norm, iota/mask, mag temps
    vmem_needed = in_bytes + w_bytes + out_bytes + acc_bytes + tmp_bytes + (8 << 20)
    try:
        vmem_cap = int(pltpu.get_tpu_info().vmem_capacity_bytes)
    except Exception:
        vmem_cap = 64 << 20                      # conservative fallback (v7x per-TC)
    vmem_limit = int(min(max(vmem_needed, 32 << 20), int(vmem_cap * 0.85)))

    kernel = _make_kernel(T, KW)

    out = pl.pallas_call(
        kernel,
        out_shape=jax.ShapeDtypeStruct((M, T_out), jnp.float32),
        grid_spec=pltpu.PrefetchScalarGridSpec(
            num_scalar_prefetch=1,
            grid=(gm, gn, gk),
            in_specs=[
                pl.BlockSpec((tm, KW), lambda i, j, k, kb_r: (i, kb_r[j] + k)),
                pl.BlockSpec((tm, KW), lambda i, j, k, kb_r: (i, kb_r[j] + k)),
                pl.BlockSpec((1, KW, tn), lambda i, j, k, kb_r: (j, k, 0)),
            ],
            out_specs=pl.BlockSpec((tm, tn), lambda i, j, k, kb_r: (i, j)),
            scratch_shapes=[pltpu.VMEM((tm, tn), jnp.float32)],
        ),
        compiler_params=pltpu.CompilerParams(
            dimension_semantics=("parallel", "parallel", "arbitrary"),
            vmem_limit_bytes=vmem_limit),
    )(kb, x_re, x_im, W)

    return out.reshape(B, F, T_out)


if __name__ == "__main__":
    # DynamicTimeStretch(win_hop=8, n_fft=30, min_rate=0.7, max_rate=1.3)
    random.seed(0)                               # deterministic host-side "random" rate
    min_rate, max_rate = 0.7, 1.3
    rate = random.random() * (max_rate - min_rate) + min_rate

    win_hop, n_fft = 8, 30
    n_freq = n_fft // 2 + 1                      # 16
    B, T = 2, 24

    key = jax.random.PRNGKey(0)
    kr, ki = jax.random.split(key)
    x_re = jax.random.normal(kr, (B, n_freq, T), dtype=jnp.float32)
    x_im = jax.random.normal(ki, (B, n_freq, T), dtype=jnp.float32)
    x = x_re + 1j * x_im                         # complex64 spectrogram

    out = dynamic_time_stretch_power(x, rate, hop_length=win_hop, n_freq=n_freq)
    out = jax.block_until_ready(out)

    # pure-numpy reference (gather form of phase_vocoder magnitudes, squared)
    xr, xi = np.asarray(x_re), np.asarray(x_im)
    norm = np.sqrt(xr * xr + xi * xi)
    norm_p = np.concatenate([norm, np.zeros((B, n_freq, 2), np.float32)], axis=-1)
    ts = np.arange(0, T, float(rate), dtype=np.float64)
    T_out = len(ts)
    i0 = np.minimum(np.floor(ts).astype(np.int64), T - 1)
    a = (ts - np.floor(ts)).astype(np.float32)
    ref = (a * norm_p[..., i0 + 1] + (1.0 - a) * norm_p[..., i0]) ** 2

    assert out.shape == (B, n_freq, T_out), (out.shape, (B, n_freq, T_out))
    np.testing.assert_allclose(np.asarray(out), ref, rtol=1e-5, atol=1e-5)

    print("KERNEL_OK")
</pallas_src>

<mosaic_0001>
module attributes {stable_mosaic.version = 11 : i64} {
  func.func @kernel(%arg0: i32, %arg1: i32, %arg2: i32, %arg3: memref<1xi32, #tpu.memory_space<smem>>, %arg4: memref<32x24xf32, #tpu.memory_space<vmem>>, %arg5: memref<32x24xf32, #tpu.memory_space<vmem>>, %arg6: memref<1x24x20xf32, #tpu.memory_space<vmem>>, %arg7: memref<32x20xf32, #tpu.memory_space<vmem>>, %arg8: memref<32x20xf32, #tpu.memory_space<vmem>>) attributes {dimension_semantics = [#tpu.dimension_semantics<parallel>, #tpu.dimension_semantics<parallel>, #tpu.dimension_semantics<arbitrary>], iteration_bounds = array<i64: 1, 1, 1>, scalar_prefetch = 1 : i64, scratch_operands = 1 : i64, tpu.core_type = #tpu.core_type<tc>, window_params = [{transform_indices = @transform_0, window_bounds = array<i64: 32, 24>}, {transform_indices = @transform_1, window_bounds = array<i64: 32, 24>}, {transform_indices = @transform_2, window_bounds = array<i64: 1, 24, 20>}, {transform_indices = @transform_3, window_bounds = array<i64: 32, 20>}]} {
    %c0_i32 = arith.constant 0 : i32
    %0 = arith.cmpi eq, %arg2, %c0_i32 : i32
    %1 = arith.extui %0 : i1 to i32
    %c0_i32_0 = arith.constant 0 : i32
    %2 = arith.cmpi ne, %1, %c0_i32_0 : i32
    scf.if %2 {
      %cst_15 = arith.constant 0.000000e+00 : f32
      %29 = vector.broadcast %cst_15 : f32 to vector<32x20xf32>
      %c0_16 = arith.constant 0 : index
      %c0_17 = arith.constant 0 : index
      %30 = vector.load %arg8[%c0_16, %c0_17] : memref<32x20xf32, #tpu.memory_space<vmem>>, vector<32x20xf32>
      tpu.vector_store %arg8[%c0_16, %c0_17], %29 {strides = array<i32>} : memref<32x20xf32, #tpu.memory_space<vmem>>, vector<32x20xf32>,
    } else {
    }
    %c0 = arith.constant 0 : index
    %c0_1 = arith.constant 0 : index
    %3 = vector.load %arg4[%c0, %c0_1] : memref<32x24xf32, #tpu.memory_space<vmem>>, vector<32x24xf32>
    %c0_2 = arith.constant 0 : index
    %c0_3 = arith.constant 0 : index
    %4 = vector.load %arg5[%c0_2, %c0_3] : memref<32x24xf32, #tpu.memory_space<vmem>>, vector<32x24xf32>
    %5 = arith.mulf %3, %3 : vector<32x24xf32>
    %6 = arith.mulf %4, %4 : vector<32x24xf32>
    %7 = arith.addf %5, %6 : vector<32x24xf32>
    %8 = math.sqrt %7 : vector<32x24xf32>
    %9 = arith.index_cast %arg1 : i32 to index
    %10 = memref.load %arg3[%9] : memref<1xi32, #tpu.memory_space<smem>>
    %11 = arith.addi %10, %arg2 : i32
    %c24_i32 = arith.constant 24 : i32
    %12 = arith.muli %11, %c24_i32 : i32
    %13 = tpu.iota {dimensions = array<i32: 1>} : vector<32x24xi32>
    %14 = vector.broadcast %12 : i32 to vector<32x24xi32>
    %15 = arith.addi %14, %13 : vector<32x24xi32>
    %c24_i32_4 = arith.constant 24 : i32
    %16 = vector.broadcast %c24_i32_4 : i32 to vector<32x24xi32>
    %17 = arith.cmpi slt, %15, %16 : vector<32x24xi32>
    %cst = arith.constant 0.000000e+00 : f32
    %18 = vector.broadcast %cst : f32 to vector<32x24xf32>
    %19 = arith.select %17, %8, %18 : vector<32x24xi1>, vector<32x24xf32>
    %c0_5 = arith.constant 0 : index
    %c0_6 = arith.constant 0 : index
    %20 = vector.load %arg8[%c0_5, %c0_6] : memref<32x20xf32, #tpu.memory_space<vmem>>, vector<32x20xf32>
    %c0_7 = arith.constant 0 : index
    %c0_8 = arith.constant 0 : index
    %c0_9 = arith.constant 0 : index
    %21 = vector.load %arg6[%c0_7, %c0_8, %c0_9] : memref<1x24x20xf32, #tpu.memory_space<vmem>>, vector<1x24x20xf32>
    %22 = vector.shape_cast %21 : vector<1x24x20xf32> to vector<24x20xf32>
    %cst_10 = arith.constant dense<0.000000e+00> : vector<32x20xf32>
    %23 = tpu.matmul %19, %22, %cst_10 {dimension_numbers = #tpu.dot_dimension_numbers<[1], [0], [0], [1], [0, 0, 1, 1], [], []>, precision = #tpu.contract_precision<fp32>} : vector<32x24xf32>, vector<24x20xf32>, vector<32x20xf32> -> vector<32x20xf32>
    %24 = arith.addf %20, %23 : vector<32x20xf32>
    %c0_11 = arith.constant 0 : index
    %c0_12 = arith.constant 0 : index
    %25 = vector.load %arg8[%c0_11, %c0_12] : memref<32x20xf32, #tpu.memory_space<vmem>>, vector<32x20xf32>
    tpu.vector_store %arg8[%c0_11, %c0_12], %24 {strides = array<i32>} : memref<32x20xf32, #tpu.memory_space<vmem>>, vector<32x20xf32>,
    %c0_i32_13 = arith.constant 0 : i32
    %26 = arith.cmpi eq, %arg2, %c0_i32_13 : i32
    %27 = arith.extui %26 : i1 to i32
    %c0_i32_14 = arith.constant 0 : i32
    %28 = arith.cmpi ne, %27, %c0_i32_14 : i32
    scf.if %28 {
      %c0_15 = arith.constant 0 : index
      %c0_16 = arith.constant 0 : index
      %29 = vector.load %arg8[%c0_15, %c0_16] : memref<32x20xf32, #tpu.memory_space<vmem>>, vector<32x20xf32>
      %30 = arith.mulf %29, %29 : vector<32x20xf32>
      %c0_17 = arith.constant 0 : index
      %c0_18 = arith.constant 0 : index
      %31 = vector.load %arg7[%c0_17, %c0_18] : memref<32x20xf32, #tpu.memory_space<vmem>>, vector<32x20xf32>
      tpu.vector_store %arg7[%c0_17, %c0_18], %30 {strides = array<i32>} : memref<32x20xf32, #tpu.memory_space<vmem>>, vector<32x20xf32>,
    } else {
    }
    return
  }
  func.func @transform_0(%arg0: i32, %arg1: i32, %arg2: i32, %arg3: memref<1xi32, #tpu.memory_space<smem>>) -> (i32, i32) {
    %0 = arith.index_cast %arg1 : i32 to index
    %1 = memref.load %arg3[%0] : memref<1xi32, #tpu.memory_space<smem>>
    %2 = arith.addi %1, %arg2 : i32
    %c0_i32 = arith.constant 0 : i32
    return %arg0, %2 : i32, i32
  }
  func.func @transform_1(%arg0: i32, %arg1: i32, %arg2: i32, %arg3: memref<1xi32, #tpu.memory_space<smem>>) -> (i32, i32) {
    %0 = arith.index_cast %arg1 : i32 to index
    %1 = memref.load %arg3[%0] : memref<1xi32, #tpu.memory_space<smem>>
    %2 = arith.addi %1, %arg2 : i32
    %c0_i32 = arith.constant 0 : i32
    return %arg0, %2 : i32, i32
  }
  func.func @transform_2(%arg0: i32, %arg1: i32, %arg2: i32, %arg3: memref<1xi32, #tpu.memory_space<smem>>) -> (i32, i32, i32) {
    %c0_i32 = arith.constant 0 : i32
    %c0_i32_0 = arith.constant 0 : i32
    return %arg1, %arg2, %c0_i32 : i32, i32, i32
  }
  func.func @transform_3(%arg0: i32, %arg1: i32, %arg2: i32, %arg3: memref<1xi32, #tpu.memory_space<smem>>) -> (i32, i32) {
    %c0_i32 = arith.constant 0 : i32
    return %arg0, %arg1 : i32, i32
  }
}

</mosaic_0001>

<bundles_post_ra>
// kernel: tpu_custom_call.1
= control target key start
LH: loop header
LB: loop body
LE: loop exit
PB: predicated region body
PF: predicated region fallthrough
CT: control target
= control target key end

     0   :  { %v140_v38 = vlaneseq  ;;  %vm156_vm9 = vcmask 195584   ;;  %vm64_vm10 = vcmask 162816   ;;  %s634_s3 = inlined_call_operand.vmem [shape: f32[1,24,20], index: 3, kind: input, shape index: {}]   ;;  %s635_s0 = inlined_call_operand.<no memory space> [shape: s32[1], index: 0, kind: input, shape index: {}]   ;;  %s636_s1 = inlined_call_operand.vmem [shape: f32[32,24], index: 1, kind: input, shape index: {}]   ;;  %s637_s2 = inlined_call_operand.vmem [shape: f32[32,24], index: 2, kind: input, shape index: {}]   ;;  %s638_s4 = inlined_call_operand.vmem [shape: f32[32,20], index: 4, kind: output, shape index: {}]  }
   0x1   :  { %v155_v0 = vld [vmem:[%s634_s3 + $0x10] sm:$0xff]  ;;  %v154_v1 = vld [vmem:[%s634_s3 + $0x8] sm:$0xff]  ;;  %v153_v2 = vld [vmem:[%s634_s3] sm:$0xff]  ;;  %p46_p0 = scmp.lt.s32.totalorder %s635_s0, 0  ;;  %s139_s6 = smul.u32 24, %s635_s0 }
   0x2   :  { %v529_v3 = vand.u32 4294901760, %v155_v0  ;;  %v531_v4 = vand.u32 4294901760, %v154_v1  ;;  %v533_v5 = vand.u32 4294901760, %v153_v2  ;;  %v141_v40 = vand.u32 127, %v140_v38 }
   0x3   :  { %s47_s25 = scalar_select %p46_p0, %s635_s0, 0  ;;  %v142_v42 = vstv %s139_s6 }
   0x4   :  { %476 = vmatpush.msra.mxu2 %v529_v3  ;;  %v235_v6 = vsub.f32 %v155_v0, %v529_v3  ;;  %v241_v7 = vsub.f32 %v154_v1, %v531_v4  ;;  %v247_v8 = vsub.f32 %v153_v2, %v533_v5  ;;  %183 = vmatpush.msra.mxu0 %v529_v3 }
   0x5   :  { %s474_s3 = sshll.u32 %s47_s25, 3  ;;  %v143_v49 = vadd.s32 %v142_v42, %v141_v40 }
   0x6   :  { %v236_v9 = vand.u32 4294901760, %v235_v6  ;;  %477 = vmatpush.msra.mxu2 %v531_v4  ;;  %v242_v10 = vand.u32 4294901760, %v241_v7  ;;  %v248_v11 = vand.u32 4294901760, %v247_v8  ;;  %s49_s28 = scalar_lea.vmem %s636_s1, %s474_s3  ;;  %s57_s5 = scalar_lea.vmem %s637_s2, %s474_s3  ;;  %185 = vmatpush.msra.mxu0 %v531_v4 }
   0x7   :  { %v69_v12 = vld [vmem:[%s49_s28] sm:$0xff]  ;;  %v70_v13 = vld [vmem:[%s49_s28 + $0x8] sm:$0xff]  ;;  %v71_v14 = vld [vmem:[%s49_s28 + $0x10] sm:$0xff]  ;;  %vm144_vm0 = vcmp.lt.s32.totalorder %v143_v49, 24 }
   0x8   :  { %v237_v15 = vsub.f32 %v235_v6, %v236_v9  ;;  %v243_v16 = vsub.f32 %v241_v7, %v242_v10  ;;  %478 = vmatpush.msra.mxu2 %v533_v5  ;;  %v249_v17 = vsub.f32 %v247_v8, %v248_v11  ;;  %v72_v18 = vld [vmem:[%s49_s28 + $0x18] sm:$0xff]  ;;  %v73_v19 = vld [vmem:[%s57_s5] sm:$0xff]  ;;  %v74_v20 = vld [vmem:[%s57_s5 + $0x8] sm:$0xff]  ;;  %v77_v21 = vmul.f32 %v69_v12, %v69_v12 }
   0x9   :  { %v75_v22 = vld [vmem:[%s57_s5 + $0x10] sm:$0xff]  ;;  %v76_v23 = vld [vmem:[%s57_s5 + $0x18] sm:$0xff]  ;;  %v78_v24 = vmul.f32 %v70_v13, %v70_v13  ;;  %v79_v25 = vmul.f32 %v71_v14, %v71_v14  ;;  %v80_v26 = vmul.f32 %v72_v18, %v72_v18  ;;  %v81_v27 = vmul.f32 %v73_v19, %v73_v19  ;;  %187 = vmatpush.msra.mxu0 %v533_v5 }
   0xa   :  { %284 = vmatpush.msrb.mxu2 %v235_v6  ;;  %v238_v28 = vand.u32 4294901760, %v237_v15  ;;  %v244_v29 = vand.u32 4294901760, %v243_v16  ;;  %v82_v30 = vmul.f32 %v74_v20, %v74_v20  ;;  %v83_v31 = vmul.f32 %v75_v22, %v75_v22 }
   0xb   :  { %v84_v32 = vmul.f32 %v76_v23, %v76_v23  ;;  %v553_v33 = vadd.f32 %v81_v27, %v77_v21  ;;  %372 = vmatpush.msrb.mxu0 %v236_v9  ;;  %v250_v34 = vand.u32 4294901760, %v249_v17 }
   0xc   :  { %287 = vmatpush.msrb.mxu2 %v241_v7  ;;  %479 = vmatpush.msra.mxu3 %v238_v28  ;;  %v555_v35 = vadd.f32 %v82_v30, %v78_v24  ;;  %v557_v36 = vadd.f32 %v83_v31, %v79_v25 }
   0xd   :  { %239 = vmatpush.msra.mxu1 %v238_v28  ;;  %v559_v37 = vadd.f32 %v84_v32, %v80_v26  ;;  %483 = vrsqrt.f32 %v553_v33  ;;  %376 = vmatpush.msrb.mxu0 %v242_v10  ;;  %vm96_vm1 = vcmp.eq.f32.partialorder %v553_v33, inf  ;;  %vm98_vm2 = vcmp.eq.f32.partialorder %v553_v33, 0.0 }
   0xe   :  { %290 = vmatpush.msrb.mxu2 %v247_v8  ;;  %480 = vmatpush.msra.mxu3 %v244_v29  ;;  %485 = vrsqrt.f32 %v555_v35  ;;  %v99_v62 = vand.u32 2147483648, %v553_v33  ;;  %vm120_vm3 = vcmp.eq.f32.partialorder %v557_v36, inf  ;;  %vm122_vm4 = vcmp.eq.f32.partialorder %v557_v36, 0.0 }
   0xf   :  { %245 = vmatpush.msra.mxu1 %v244_v29  ;;  %487 = vrsqrt.f32 %v557_v36  ;;  %380 = vmatpush.msrb.mxu0 %v248_v11  ;;  %vm108_vm5 = vcmp.eq.f32.partialorder %v555_v35, inf  ;;  %vm110_vm6 = vcmp.eq.f32.partialorder %v555_v35, 0.0  ;;  %vm132_vm7 = vcmp.eq.f32.partialorder %v559_v37, inf }
  0x10   :  { %481 = vmatpush.msra.mxu3 %v250_v34  ;;  %489 = vrsqrt.f32 %v559_v37  ;;  %v135_v8 = vand.u32 2147483648, %v559_v37  ;;  %vm134_vm8 = vcmp.eq.f32.partialorder %v559_v37, 0.0 }
  0x11   :  { %251 = vmatpush.msra.mxu1 %v250_v34 }
  0x12   :  { %326 = vmatpush.msrb.mxu3 %v529_v3 }
  0x13   :  { %412 = vmatpush.msrb.mxu1 %v529_v3  ;;  %v484_v39 = vpop.eup %483  ;;  %v111_v3 = vand.u32 2147483648, %v555_v35 }
  0x14   :  { %328 = vmatpush.msrb.mxu3 %v531_v4  ;;  %v486_v41 = vpop.eup %485  ;;  %v90_v43 = vmul.f32 %v484_v39, %v553_v33 }
  0x15   :  { %414 = vmatpush.msrb.mxu1 %v531_v4  ;;  %v488_v44 = vpop.eup %487  ;;  %v102_v45 = vmul.f32 %v486_v41, %v555_v35  ;;  %v123_v4 = vand.u32 2147483648, %v557_v36 }
  0x16   :  { %330 = vmatpush.msrb.mxu3 %v533_v5  ;;  %v490_v46 = vpop.eup %489  ;;  %v114_v47 = vmul.f32 %v488_v44, %v557_v36  ;;  %v91_v48 = vmul.f32 %v484_v39, %v90_v43 }
  0x17   :  { %416 = vmatpush.msrb.mxu1 %v533_v5  ;;  %v126_v50 = vmul.f32 %v490_v46, %v559_v37  ;;  %v103_v51 = vmul.f32 %v486_v41, %v102_v45 }
  0x18   :  { %v115_v52 = vmul.f32 %v488_v44, %v114_v47  ;;  %v92_v53 = vmul.f32 0.5, %v91_v48 }
  0x19   :  { %v127_v54 = vmul.f32 %v490_v46, %v126_v50  ;;  %v104_v55 = vmul.f32 0.5, %v103_v51 }
  0x1a   :  { %v116_v56 = vmul.f32 0.5, %v115_v52  ;;  %v93_v57 = vsub.f32 1.5, %v92_v53 }
  0x1b   :  { %v128_v58 = vmul.f32 0.5, %v127_v54  ;;  %v105_v59 = vsub.f32 1.5, %v104_v55 }
  0x1c   :  { %v117_v60 = vsub.f32 1.5, %v116_v56  ;;  %v94_v61 = vmul.f32 %v484_v39, %v93_v57 }
  0x1d   :  { %v129_v63 = vsub.f32 1.5, %v128_v58  ;;  %v106_v0 = vmul.f32 %v486_v41, %v105_v59 }
  0x1e   :  { %v118_v1 = vmul.f32 %v488_v44, %v117_v60  ;;  %v95_v2 = vmul.f32 %v94_v61, %v553_v33 }
  0x1f   :  { %v130_v5 = vmul.f32 %v490_v46, %v129_v63  ;;  %v107_v6 = vmul.f32 %v106_v0, %v555_v35  ;;  %v491_v46 = vmov 0.0  }
  0x20   :  { %v119_v7 = vmul.f32 %v118_v1, %v557_v36  ;;  %v97_v9 = vsel %vm96_vm1, %v553_v33, %v95_v2  ;;  %65 = vst.msk [vmem:[#allocation2] sm:$0xff] %vm64_vm10, %v491_v46 }
  0x21   :  { %v131_v10 = vmul.f32 %v130_v5, %v559_v37  ;;  %v100_v11 = vsel %vm98_vm2, %v99_v62, %v97_v9  ;;  %v109_v12 = vsel %vm108_vm5, %v555_v35, %v107_v6  ;;  %66 = vst.msk [vmem:[#allocation2 + $0x8] sm:$0xff] %vm64_vm10, %v491_v46 }
  0x22   :  { %v121_v13 = vsel %vm120_vm3, %v557_v36, %v119_v7  ;;  %v145_v14 = vsel %vm144_vm0, %v100_v11, 0.0  ;;  %v112_v15 = vsel %vm110_vm6, %v111_v3, %v109_v12  ;;  %67 = vst.msk [vmem:[#allocation2 + $0x10] sm:$0xff] %vm64_vm10, %v491_v46 }
  0x23   :  { %v124_v16 = vsel %vm122_vm4, %v123_v4, %v121_v13  ;;  %v133_v17 = vsel %vm132_vm7, %v559_v37, %v131_v10  ;;  %v158_v18 = vsel %vm156_vm9, %v145_v14, 0  ;;  %v146_v19 = vsel %vm144_vm0, %v112_v15, 0.0  ;;  %68 = vst.msk [vmem:[#allocation2 + $0x18] sm:$0xff] %vm64_vm10, %v491_v46 }
  0x24   :  { %v147_v20 = vsel %vm144_vm0, %v124_v16, 0.0  ;;  %v136_v21 = vsel %vm134_vm8, %v135_v8, %v133_v17  ;;  %v188_v22 = vand.u32 4294901760, %v158_v18  ;;  %v161_v23 = vsel %vm156_vm9, %v146_v19, 0 }
  0x25   :  { %v164_v24 = vsel %vm156_vm9, %v147_v20, 0  ;;  %v148_v25 = vsel %vm144_vm0, %v136_v21, 0.0  ;;  %v196_v26 = vand.u32 4294901760, %v161_v23 }
  0x26   :  { %v204_v27 = vand.u32 4294901760, %v164_v24  ;;  %v167_v28 = vsel %vm156_vm9, %v148_v25, 0  ;;  %v189_v29 = vsub.f32 %v158_v18, %v188_v22  ;;  %253 = vmatmul.f32.vlgmr.msra.gmra.mxu1 %v188_v22 }
  0x27   :  { %v212_v30 = vand.u32 4294901760, %v167_v28  ;;  %v197_v31 = vsub.f32 %v161_v23, %v196_v26  ;;  %v149_v0 = vld [vmem:[#allocation2] sm:$0xff] }
  0x28   :  { %v205_v32 = vsub.f32 %v164_v24, %v204_v27  ;;  %261 = vmatmul.f32.vlgmr.msra.gmra.mxu3 %v204_v27  ;;  %v190_v33 = vand.u32 4294901760, %v189_v29  ;;  %v150_v10 = vld [vmem:[#allocation2 + $0x8] sm:$0xff] }
  0x29   :  { %v213_v34 = vsub.f32 %v167_v28, %v212_v30  ;;  %v198_v37 = vand.u32 4294901760, %v197_v31  ;;  %v151_v23 = vld [vmem:[#allocation2 + $0x10] sm:$0xff] }
  0x2a   :  { %v206_v35 = vand.u32 4294901760, %v205_v32  ;;  %v191_v36 = vsub.f32 %v189_v29, %v190_v33 }
  0x2b   :  { %v214_v39 = vand.u32 4294901760, %v213_v34  ;;  %v199_v42 = vsub.f32 %v197_v31, %v198_v37 }
  0x2c   :  { %v207_v38 = vsub.f32 %v205_v32, %v206_v35  ;;  %v192_v40 = vand.u32 4294901760, %v191_v36  ;;  %v152_v36 = vld [vmem:[#allocation2 + $0x18] sm:$0xff] }
  0x2d   :  { %v215_v43 = vsub.f32 %v213_v34, %v214_v39  ;;  %v200_v44 = vand.u32 4294901760, %v199_v42 }
  0x2e   :  { %v208_v41 = vand.u32 4294901760, %v207_v38  ;;  %193 = vmatmul.f32.vlgmr.msra.gmra.mxu0 %v192_v40  ;;  %257 = vmatmul.f32.gmra.mxu1 %v196_v26 }
  0x2f   :  { %v216_v45 = vand.u32 4294901760, %v215_v43 }
  0x30   :  { %209 = vmatmul.f32.vlgmr.msra.gmra.mxu2 %v208_v41  ;;  %265 = vmatmul.f32.gmra.mxu3 %v212_v30 }
  0x36   :  { %201 = vmatmul.f32.gmra.mxu0 %v200_v44  ;;  %418 = vmatmul.f32.vlgmr.msrb.gmra.mxu1 %v188_v22 }
  0x38   :  { %217 = vmatmul.f32.gmra.mxu2 %v216_v45  ;;  %334 = vmatmul.f32.vlgmr.msrb.gmra.mxu3 %v190_v33 }
  0x3e   :  { %382 = vmatmul.f32.vlgmr.msrb.gmra.mxu0 %v188_v22  ;;  %422 = vmatmul.f32.gmra.mxu1 %v196_v26 }
  0x40   :  { %293 = vmatmul.f32.vlgmr.msrb.gmra.mxu2 %v189_v29  ;;  %340 = vmatmul.f32.gmra.mxu3 %v198_v37 }
  0x46   :  { %386 = vmatmul.f32.gmra.mxu0 %v196_v26  ;;  %426 = vmatmul.f32.gmra.mxu1 %v204_v27 }
  0x48   :  { %298 = vmatmul.f32.gmra.mxu2 %v197_v31  ;;  %346 = vmatmul.f32.gmra.mxu3 %v206_v35 }
  0x4e   :  { %390 = vmatmul.f32.gmra.mxu0 %v204_v27  ;;  %430 = vmatmul.f32.gmra.mxu1 %v212_v30 }
  0x50   :  { %303 = vmatmul.f32.gmra.mxu2 %v205_v32  ;;  %352 = vmatmul.f32.gmra.mxu3 %v214_v39 }
  0x56   :  { %394 = vmatmul.f32.gmra.mxu0 %v212_v30 }
  0x58   :  { %308 = vmatmul.f32.gmra.mxu2 %v213_v34 }
  0xa3   :  { %v254_v49 = vpop.f32.mrf.mxu1 }
  0xab   :  { %v262_v47 = vpop.f32.mrf.mxu3  ;;  %v194_v48 = vpop.f32.mrf.mxu0 }
  0xac   :  { %v258_v53 = vpop.f32.mrf.mxu1  ;;  %v255_v58 = vadd.f32 %v254_v49, %v194_v48 }
  0xb3   :  { %v210_v50 = vpop.f32.mrf.mxu2  ;;  %v266_v51 = vpop.f32.mrf.mxu3 }
  0xb4   :  { %v202_v52 = vpop.f32.mrf.mxu0  ;;  %v419_v57 = vpop.f32.mrf.mxu1  ;;  %v263_v12 = vadd.f32 %v262_v47, %v210_v50 }
  0xb5   :  { %v259_v2 = vadd.f32 %v258_v53, %v202_v52 }
  0xbb   :  { %v218_v54 = vpop.f32.mrf.mxu2  ;;  %v335_v55 = vpop.f32.mrf.mxu3 }
  0xbc   :  { %v383_v56 = vpop.f32.mrf.mxu0  ;;  %v423_v5 = vpop.f32.mrf.mxu1  ;;  %v267_v24 = vadd.f32 %v266_v51, %v218_v54 }
  0xc3   :  { %v294_v59 = vpop.f32.mrf.mxu2  ;;  %v341_v62 = vpop.f32.mrf.mxu3 }
  0xc4   :  { %v295_v60 = vadd.f32 %v294_v59, %v255_v58  ;;  %v387_v1 = vpop.f32.mrf.mxu0  ;;  %v427_v19 = vpop.f32.mrf.mxu1 }
  0xc6   :  { %v336_v61 = vadd.f32 %v335_v55, %v295_v60 }
  0xc8   :  { %v384_v63 = vadd.f32 %v383_v56, %v336_v61 }
  0xca   :  { %v420_v3 = vadd.f32 %v419_v57, %v384_v63 }
  0xcb   :  { %v299_v4 = vpop.f32.mrf.mxu2  ;;  %v347_v11 = vpop.f32.mrf.mxu3 }
  0xcc   :  { %v434_v6 = vadd.f32 %v420_v3, %v149_v0  ;;  %v300_v7 = vadd.f32 %v299_v4, %v259_v2  ;;  %v391_v15 = vpop.f32.mrf.mxu0  ;;  %v431_v34 = vpop.f32.mrf.mxu1 }
  0xce   :  { %439 = vst.msk [vmem:[#allocation2] sm:$0xff] %vm64_vm10, %v434_v6  ;;  %v342_v8 = vadd.f32 %v341_v62, %v300_v7 }
  0xd0   :  { %v388_v9 = vadd.f32 %v387_v1, %v342_v8 }
  0xd2   :  { %v424_v13 = vadd.f32 %v423_v5, %v388_v9 }
  0xd3   :  { %v304_v14 = vpop.f32.mrf.mxu2  ;;  %v353_v27 = vpop.f32.mrf.mxu3 }
  0xd4   :  { %v435_v16 = vadd.f32 %v424_v13, %v150_v10  ;;  %v305_v17 = vadd.f32 %v304_v14, %v263_v12  ;;  %v395_v31 = vpop.f32.mrf.mxu0 }
  0xd5   :  { %v446_v18 = vld [vmem:[#allocation2] sm:$0xff] }
  0xd6   :  { %v450_v20 = vmul.f32 %v446_v18, %v446_v18  ;;  %440 = vst.msk [vmem:[#allocation2 + $0x8] sm:$0xff] %vm64_vm10, %v435_v16  ;;  %v348_v21 = vadd.f32 %v347_v11, %v305_v17 }
  0xd8   :  { %454 = vst.msk [vmem:[%s638_s4] sm:$0xff] %vm64_vm10, %v450_v20  ;;  %v392_v22 = vadd.f32 %v391_v15, %v348_v21 }
  0xda   :  { %v428_v25 = vadd.f32 %v427_v19, %v392_v22 }
  0xdb   :  { %v309_v26 = vpop.f32.mrf.mxu2 }
  0xdc   :  { %v436_v28 = vadd.f32 %v428_v25, %v151_v23  ;;  %v310_v29 = vadd.f32 %v309_v26, %v267_v24 }
  0xdd   :  { %v447_v30 = vld [vmem:[#allocation2 + $0x8] sm:$0xff] }
  0xde   :  { %v451_v32 = vmul.f32 %v447_v30, %v447_v30  ;;  %441 = vst.msk [vmem:[#allocation2 + $0x10] sm:$0xff] %vm64_vm10, %v436_v28  ;;  %v354_v33 = vadd.f32 %v353_v27, %v310_v29 }
  0xe0   :  { %455 = vst.msk [vmem:[%s638_s4 + $0x8] sm:$0xff] %vm64_vm10, %v451_v32  ;;  %v396_v35 = vadd.f32 %v395_v31, %v354_v33 }
  0xe2   :  { %v432_v37 = vadd.f32 %v431_v34, %v396_v35 }
  0xe4   :  { %v437_v38 = vadd.f32 %v432_v37, %v152_v36 }
  0xe5   :  { %v448_v39 = vld [vmem:[#allocation2 + $0x10] sm:$0xff] }
  0xe6   :  { %v452_v40 = vmul.f32 %v448_v39, %v448_v39  ;;  %442 = vst.msk [vmem:[#allocation2 + $0x18] sm:$0xff] %vm64_vm10, %v437_v38 }
  0xe8   :  { %456 = vst.msk [vmem:[%s638_s4 + $0x10] sm:$0xff] %vm64_vm10, %v452_v40 }
  0xed   :  { %v449_v41 = vld [vmem:[#allocation2 + $0x18] sm:$0xff] }
  0xee   :  { %v453_v42 = vmul.f32 %v449_v41, %v449_v41 }
  0xf0   :  { %457 = vst.msk [vmem:[%s638_s4 + $0x18] sm:$0xff] %vm64_vm10, %v453_v42 }

</bundles_post_ra>
